<compile_context>
chip_gen: v7x
topology: tpu7x:2x2x1
jax: 0.10.0
libtpu: 0.0.40
codegen_flags: <defaults>
</compile_context>

<pallas_src>
import jax
import jax.numpy as jnp
import numpy as np
from jax import lax
from jax.experimental import pallas as pl
from jax.experimental.pallas import tpu as pltpu

_LANES = 128
_SUBLANES = 8


def _l1_partial_kernel(p_ref, t_ref, out_ref):
    # p_ref/t_ref: (block_rows, 128) f32 tiles; out_ref: (8, 128) f32 per-block partial sums.
    n_chunks = p_ref.shape[0] // _SUBLANES

    def body(i, acc):
        r = pl.multiple_of(i * _SUBLANES, _SUBLANES)
        p = p_ref[pl.ds(r, _SUBLANES), :]
        t = t_ref[pl.ds(r, _SUBLANES), :]
        return acc + jnp.abs(p - t)          # mask already folded into p and t

    acc0 = jnp.zeros((_SUBLANES, _LANES), jnp.float32)
    out_ref[...] = lax.fori_loop(0, n_chunks, body, acc0, unroll=min(4, n_chunks))


def l1_loss_pallas(output, mask, ind, target, *, block_rows=2048):
    """output: (B, C, H, W); mask: (B, K); ind: (B, K) int; target: (B, K, C). Returns scalar loss."""
    B, C, H, W = output.shape
    K = ind.shape[1]
    E = B * K * C                                               # elements averaged over

    # ---- glue (plain JAX, layout plumbing only): gather B*K rows; no full-feat f32 copy ----
    feat = jnp.transpose(output, (0, 2, 3, 1)).reshape(B, H * W, C)            # view, fused by XLA
    pred = jnp.take_along_axis(feat, ind[..., None].astype(jnp.int32), axis=1)  # (B, K, C)

    # Fold the mask into both operands here (fuses with astype/pad/reshape in one producer pass):
    mw = mask.astype(jnp.float32)[..., None]                    # (B, K, 1)
    p_flat = (pred.astype(jnp.float32) * mw).reshape(-1)        # only gathered rows are upcast
    t_flat = (target.astype(jnp.float32) * mw).reshape(-1)

    # ---- lane-dense layout: flatten to (rows, 128), tile rows by block_rows (multiple of 8) ----
    rows = pl.cdiv(E, _LANES)
    rows_rounded = ((rows + _SUBLANES - 1) // _SUBLANES) * _SUBLANES
    block_rows = max(_SUBLANES, min(int(block_rows), rows_rounded))
    block_rows = (block_rows // _SUBLANES) * _SUBLANES          # force multiple of 8
    # v7x has 2 TensorCores: avoid collapsing to a single block when there is enough work.
    if rows_rounded > _SUBLANES and pl.cdiv(rows_rounded, block_rows) < 2:
        half = (rows_rounded // 2 + _SUBLANES - 1) // _SUBLANES * _SUBLANES
        block_rows = max(_SUBLANES, half)
    num_blocks = pl.cdiv(rows_rounded, block_rows)
    rows_pad = num_blocks * block_rows
    e_pad = rows_pad * _LANES

    def slab(x):
        return jnp.pad(x, (0, e_pad - E)).reshape(rows_pad, _LANES)   # zero pad -> contributes 0

    p2, t2 = slab(p_flat), slab(t_flat)

    in_spec = pl.BlockSpec((block_rows, _LANES), lambda i: (i, 0))
    partials = pl.pallas_call(
        _l1_partial_kernel,
        out_shape=jax.ShapeDtypeStruct((num_blocks * _SUBLANES, _LANES), jnp.float32),
        grid_spec=pltpu.PrefetchScalarGridSpec(
            num_scalar_prefetch=0,
            grid=(num_blocks,),
            in_specs=[in_spec, in_spec],
            out_specs=pl.BlockSpec((_SUBLANES, _LANES), lambda i: (i, 0)),
        ),
        compiler_params=pltpu.CompilerParams(
            dimension_semantics=("parallel",),   # independent output blocks -> megacore friendly
        ),
    )(p2, t2)

    # Tiny final reduce + PyTorch 'elementwise_mean' divide in plain JAX.
    return jnp.sum(partials) / jnp.float32(E)


def l1_loss_reference(output, mask, ind, target):
    B, C, H, W = output.shape
    feat = jnp.transpose(output, (0, 2, 3, 1)).reshape(B, H * W, C).astype(jnp.float32)
    pred = jnp.take_along_axis(feat, ind[..., None].astype(jnp.int32), axis=1)  # (B, K, C)
    m = mask.astype(jnp.float32)[..., None]
    return jnp.mean(jnp.abs(pred * m - target.astype(jnp.float32) * m))


if __name__ == "__main__":
    key = jax.random.PRNGKey(0)

    # Case 1: shapes implied by the module (small).
    k1, k2, k3, k4 = jax.random.split(key, 4)
    B, C, H, W, K = 2, 4, 16, 16, 8
    output = jax.random.normal(k1, (B, C, H, W), dtype=jnp.float32)
    target = jax.random.normal(k2, (B, K, C), dtype=jnp.float32)
    ind = jax.random.randint(k3, (B, K), 0, H * W, dtype=jnp.int32)
    mask = (jax.random.uniform(k4, (B, K)) > 0.3).astype(jnp.float32)

    loss = jax.block_until_ready(l1_loss_pallas(output, mask, ind, target))
    ref = l1_loss_reference(output, mask, ind, target)
    assert np.allclose(np.asarray(loss), np.asarray(ref), rtol=1e-5, atol=1e-6), (loss, ref)

    # Case 2: slightly larger, exercises the multi-block / in-kernel fori accumulation path.
    k5, k6, k7, k8 = jax.random.split(jax.random.fold_in(key, 1), 4)
    B2, C2, H2, W2, K2 = 2, 64, 16, 16, 128
    output2 = jax.random.normal(k5, (B2, C2, H2, W2), dtype=jnp.float32)
    target2 = jax.random.normal(k6, (B2, K2, C2), dtype=jnp.float32)
    ind2 = jax.random.randint(k7, (B2, K2), 0, H2 * W2, dtype=jnp.int32)
    mask2 = (jax.random.uniform(k8, (B2, K2)) > 0.3).astype(jnp.float32)

    loss2 = jax.block_until_ready(l1_loss_pallas(output2, mask2, ind2, target2))
    ref2 = l1_loss_reference(output2, mask2, ind2, target2)
    assert np.allclose(np.asarray(loss2), np.asarray(ref2), rtol=1e-5, atol=1e-6), (loss2, ref2)

    print("KERNEL_OK")
</pallas_src>

<mosaic_0001>
module attributes {stable_mosaic.version = 11 : i64} {
  func.func @_l1_partial_kernel(%arg0: i32, %arg1: memref<8x128xf32, #tpu.memory_space<vmem>>, %arg2: memref<8x128xf32, #tpu.memory_space<vmem>>, %arg3: memref<8x128xf32, #tpu.memory_space<vmem>>) attributes {dimension_semantics = [#tpu.dimension_semantics<parallel>], iteration_bounds = array<i64: 1>, scalar_prefetch = 0 : i64, scratch_operands = 0 : i64, tpu.core_type = #tpu.core_type<tc>, window_params = [{transform_indices = @transform_0, window_bounds = array<i64: 8, 128>}, {transform_indices = @transform_1, window_bounds = array<i64: 8, 128>}, {transform_indices = @transform_2, window_bounds = array<i64: 8, 128>}]} {
    %cst = arith.constant 0.000000e+00 : f32
    %0 = vector.broadcast %cst : f32 to vector<8x128xf32>
    %c0_i32 = arith.constant 0 : i32
    %c8_i32 = arith.constant 8 : i32
    %1 = arith.muli %c0_i32, %c8_i32 : i32
    %2 = tpu.assume_multiple %1, 8 : i32
    %3 = arith.index_cast %2 : i32 to index
    %c0 = arith.constant 0 : index
    %4 = vector.load %arg1[%3, %c0] : memref<8x128xf32, #tpu.memory_space<vmem>>, vector<8x128xf32>
    %5 = arith.index_cast %2 : i32 to index
    %c0_0 = arith.constant 0 : index
    %6 = vector.load %arg2[%5, %c0_0] : memref<8x128xf32, #tpu.memory_space<vmem>>, vector<8x128xf32>
    %7 = arith.subf %4, %6 : vector<8x128xf32>
    %8 = math.absf %7 : vector<8x128xf32>
    %9 = arith.addf %0, %8 : vector<8x128xf32>
    %c1_i32 = arith.constant 1 : i32
    %c0_1 = arith.constant 0 : index
    %c0_2 = arith.constant 0 : index
    %10 = vector.load %arg3[%c0_1, %c0_2] : memref<8x128xf32, #tpu.memory_space<vmem>>, vector<8x128xf32>
    tpu.vector_store %arg3[%c0_1, %c0_2], %9 {strides = array<i32>} : memref<8x128xf32, #tpu.memory_space<vmem>>, vector<8x128xf32>,
    return
  }
  func.func @transform_0(%arg0: i32) -> (i32, i32) {
    %c0_i32 = arith.constant 0 : i32
    %c0_i32_0 = arith.constant 0 : i32
    return %arg0, %c0_i32 : i32, i32
  }
  func.func @transform_1(%arg0: i32) -> (i32, i32) {
    %c0_i32 = arith.constant 0 : i32
    %c0_i32_0 = arith.constant 0 : i32
    return %arg0, %c0_i32 : i32, i32
  }
  func.func @transform_2(%arg0: i32) -> (i32, i32) {
    %c0_i32 = arith.constant 0 : i32
    %c0_i32_0 = arith.constant 0 : i32
    return %arg0, %c0_i32 : i32, i32
  }
}

</mosaic_0001>

<bundles_post_ra>
// kernel: tpu_custom_call.1
= control target key start
LH: loop header
LB: loop body
LE: loop exit
PB: predicated region body
PF: predicated region fallthrough
CT: control target
= control target key end

     0   :  { %7 = vsyncpa [#allocation3], 0  ;;  %s187_s0 = inlined_call_operand.hbm [shape: f32[8,128], index: 0, kind: input, shape index: {}]   ;;  %s188_s1 = inlined_call_operand.hbm [shape: f32[8,128], index: 1, kind: input, shape index: {}]   ;;  %s189_s2 = inlined_call_operand.hbm [shape: f32[8,128], index: 2, kind: output, shape index: {}]  }
   0x1   :  { %8 = vsyncpa [#allocation6], 0 }
   0x2   :  { %9 = vsyncpa [#allocation4], 0  ;;  %s133_s9 = smov [#allocation2]   ;;  %s134_s11 = smov [#allocation5]  }
   0x3   :  { %s16_s10 = sshll.u32 %s133_s9, 4  ;;  %s26_s12 = sshll.u32 %s134_s11, 4  ;;  %s17_s10 = int_to_ptr.vmem [resolvable:$true] %s16_s10  ;;  %s27_s12 = int_to_ptr.vmem [resolvable:$true] %s26_s12 }
   0x4   :  { %s61_s15 = scalar_lea.hbm %s187_s0, 128 }
   0x5   :  { %p62_p0 = scmp.ne.s32.totalorder %s187_s0, %s61_s15  ;;  %p65_p1 = scmp.lt.u32.totalorder %s61_s15, %s187_s0 }
   0x7   :  { %p67_p2 = pnand %p65_p1, %p62_p0 }
   0x9   :  { %70 = shalt.err (!%p67_p2)
}
   0xa   :  { %s71_s20 = scalar_lea.vmem %s17_s10, 128  ;;  %p76_p4 = scmp.lt.s32.totalorder %s17_s10, %s17_s10 }
   0xb   :  { %p72_p3 = scmp.ne.s32.totalorder %s17_s10, %s71_s20  ;;  %p77_p5 = scmp.lt.s32.totalorder %s71_s20, %s71_s20 }
   0xd   :  { %p78_p6 = por %p77_p5, %p76_p4 }
   0xf   :  { %p79_p7 = pnand %p78_p6, %p72_p3 }
  0x11   :  { %82 = shalt.err (!%p79_p7)
}
  0x12   :  { %19 = dma.hbm_to_vmem [thread:$0]  %s187_s0, 128, %s17_s10, [#allocation3]  }
  0x13   :  { %s83_s25 = scalar_lea.hbm %s188_s1, 128 }
  0x14   :  { %p84_p8 = scmp.ne.s32.totalorder %s188_s1, %s83_s25  ;;  %p87_p9 = scmp.lt.u32.totalorder %s83_s25, %s188_s1 }
  0x16   :  { %p89_p10 = pnand %p87_p9, %p84_p8 }
  0x18   :  { %92 = shalt.err (!%p89_p10)
}
  0x19   :  { %s93_s30 = scalar_lea.vmem %s27_s12, 128  ;;  %p98_p12 = scmp.lt.s32.totalorder %s27_s12, %s27_s12 }
  0x1a   :  { %p94_p11 = scmp.ne.s32.totalorder %s27_s12, %s93_s30  ;;  %p99_p13 = scmp.lt.s32.totalorder %s93_s30, %s93_s30 }
  0x1c   :  { %p100_p0 = por %p99_p13, %p98_p12 }
  0x1e   :  { %p101_p1 = pnand %p100_p0, %p94_p11 }
  0x20   :  { %104 = shalt.err (!%p101_p1)
}
  0x21   :  { %29 = dma.hbm_to_vmem [thread:$0]  %s188_s1, 128, %s27_s12, [#allocation6]  }
  0x22   :  { %127 = dma.done.wait [#allocation3], 128  }
  0x23   :  { %128 = vsyncadd [#allocation3], 4294967168 }
  0x24   :  { %129 = dma.done.wait [#allocation6], 128  }
  0x25   :  { %130 = vsyncadd [#allocation6], 4294967168  ;;  %v36_v0 = vld [vmem:[#allocation2] sm:$0xff]  ;;  %v37_v1 = vld [vmem:[#allocation5] sm:$0xff]  ;;  %s135_s4 = smov [#allocation7]  }
  0x26   :  { %s48_s5 = sshll.u32 %s135_s4, 4  ;;  %v38_v2 = vsub.f32 %v36_v0, %v37_v1  ;;  %s49_s5 = int_to_ptr.vmem [resolvable:$true] %s48_s5 }
  0x27   :  { %s105_s6 = scalar_lea.vmem %s49_s5, 128  ;;  %p110_p3 = scmp.lt.s32.totalorder %s49_s5, %s49_s5 }
  0x28   :  { %v39_v3 = vand.u32 2147483647, %v38_v2  ;;  %p106_p2 = scmp.ne.s32.totalorder %s49_s5, %s105_s6  ;;  %p111_p4 = scmp.lt.s32.totalorder %s105_s6, %s105_s6 }
  0x2a   :  { %41 = vst [vmem:[#allocation7] sm:$0xff] %v39_v3  ;;  %p112_p5 = por %p111_p4, %p110_p3 }
  0x2c   :  { %p113_p6 = pnand %p112_p5, %p106_p2 }
  0x2e   :  { %116 = shalt.err (!%p113_p6)
}
  0x2f   :  { %s117_s8 = scalar_lea.hbm %s189_s2, 128 }
  0x30   :  { %p118_p7 = scmp.ne.s32.totalorder %s189_s2, %s117_s8  ;;  %p121_p8 = scmp.lt.u32.totalorder %s117_s8, %s189_s2 }
  0x32   :  { %p123_p9 = pnand %p121_p8, %p118_p7 }
  0x34   :  { %126 = shalt.err (!%p123_p9)
}
  0x35   :  { %51 = dma.vmem_to_hbm [thread:$0]  %s49_s5, 128, %s189_s2, [#allocation4]  }
  0x36   :  { %131 = dma.done.wait [#allocation4], 128  }
  0x37   :  { %132 = vsyncadd [#allocation4], 4294967168 }
  0x38   :  { %55 = vsyncpa [#allocation3], 1 }
  0x39   :  { %56 = vsyncpa [#allocation6], 1 }
  0x3a   :  { %57 = vsyncpa [#allocation4], 1 }

</bundles_post_ra>
